<compile_context>
chip_gen: v6e
topology: v6e:2x2x1
jax: 0.10.0
libtpu: 0.0.40
codegen_flags: <defaults>
</compile_context>

<pallas_src>
import jax
import jax.numpy as jnp
from jax.experimental import pallas as pl
from jax.experimental.pallas import tpu as pltpu


def policy_mlp_kernel(x_ref, w1_ref, b1_ref, w2_ref, b2_ref, o_ref):
    # x_ref:  (TB, D_in)   streamed per grid step (bf16 by default)
    # w1_ref: (D_in, H)    resident across the whole grid (bf16 by default)
    # b1_ref: (1, H)       f32
    # w2_ref: (H, D_out)   f32
    # b2_ref: (1, D_out)   f32
    # o_ref:  (TB, D_out)  f32
    h = jnp.dot(x_ref[...], w1_ref[...],
                preferred_element_type=jnp.float32)      # [TB, H], f32 accumulate
    h = jnp.maximum(h + b1_ref[...], 0.0)                # bias + ReLU in f32
    y = jnp.dot(h, w2_ref[...],
                preferred_element_type=jnp.float32)      # [TB, D_out], f32
    o_ref[...] = (y + b2_ref[...]).astype(o_ref.dtype)


def _round_up(x, m):
    return ((x + m - 1) // m) * m


def policy_network_forward(x, w1, b1, w2, b2, *, block_b=8192,
                           x_dtype=jnp.bfloat16):
    """y = relu(x @ w1 + b1) @ w2 + b2.

    x: [B, D_in]; w1: [D_in, H]; b1: [1, H]; w2: [H, D_out]; b2: [1, D_out].
    block_b: max batch-tile rows per grid step (sweep 4096-16384 for large B).
    x_dtype: dtype of the x / w1 matmul operands only (bf16 halves the dominant
      HBM stream and is MXU-native on all generations); everything downstream
      (h, w2, biases, accumulation, output) stays f32.
    """
    B, D_in = x.shape
    H = w1.shape[1]
    D_out = w2.shape[1]

    x_itemsize = jnp.dtype(x_dtype).itemsize
    sublane = 16 if x_itemsize == 2 else 8

    x_c = x.astype(x_dtype)
    w1_c = w1.astype(x_dtype)
    w2_f = w2.astype(jnp.float32)
    b1_f = b1.astype(jnp.float32)
    b2_f = b2.astype(jnp.float32)

    # Batch tile: multiple of the sublane pack, no larger than requested, no
    # larger than the (rounded-up) batch.  No host-side padding of x.
    tb = min(_round_up(int(block_b), sublane), _round_up(B, sublane))
    # Cap at ~B/2 when the batch allows it, so the grid has >= 2 steps and the
    # "parallel" batch axis can actually split across v7x's two TensorCores.
    if B > sublane:
        tb = min(tb, max(_round_up(pl.cdiv(B, 2), sublane), sublane))
    tb = max(tb, sublane)
    grid = (pl.cdiv(B, tb),)

    # VMEM budget: double-buffered x/out tiles + resident weights + the
    # materialized (tb, H) f32 intermediate, with headroom.
    est_vmem = (2 * tb * D_in * x_itemsize
                + 2 * tb * D_out * 4
                + 2 * (D_in * H * x_itemsize + H * D_out * 4 + (H + D_out) * 4)
                + 2 * tb * H * 4)
    vmem_limit = int(min(max(32 << 20, 2 * est_vmem), 64 << 20))

    # Advisory cost so XLA schedules sensibly around this custom call.
    cost = pl.CostEstimate(
        flops=2 * B * (D_in * H + H * D_out),
        transcendentals=0,
        bytes_accessed=(B * D_in * x_itemsize          # x in
                        + D_in * H * x_itemsize        # w1
                        + H * D_out * 4                # w2
                        + (H + D_out) * 4              # biases
                        + B * D_out * 4),              # y out
    )

    return pl.pallas_call(
        policy_mlp_kernel,
        out_shape=jax.ShapeDtypeStruct((B, D_out), jnp.float32),
        grid_spec=pltpu.PrefetchScalarGridSpec(
            num_scalar_prefetch=0,
            grid=grid,
            in_specs=[
                pl.BlockSpec((tb, D_in), lambda i: (i, 0)),    # streamed activations
                pl.BlockSpec((D_in, H), lambda i: (0, 0)),     # resident weights
                pl.BlockSpec((1, H), lambda i: (0, 0)),        # resident bias
                pl.BlockSpec((H, D_out), lambda i: (0, 0)),    # resident weights
                pl.BlockSpec((1, D_out), lambda i: (0, 0)),    # resident bias
            ],
            out_specs=pl.BlockSpec((tb, D_out), lambda i: (i, 0)),
        ),
        compiler_params=pltpu.CompilerParams(
            dimension_semantics=("parallel",),   # independent batch tiles
            vmem_limit_bytes=vmem_limit,
        ),
        cost_estimate=cost,
    )(x_c, w1_c, b1_f, w2_f, b2_f)


def init_params(key, input_dim, output_dim, hidden=128):
    """Deterministic init mimicking PyTorch nn.Linear's U(-1/sqrt(fan_in), +)."""
    k1, k2, k3, k4 = jax.random.split(key, 4)
    bound1 = 1.0 / (input_dim ** 0.5)
    bound2 = 1.0 / (hidden ** 0.5)
    # Stored pre-transposed relative to PyTorch's [out, in] convention.
    w1 = jax.random.uniform(k1, (input_dim, hidden), jnp.float32, -bound1, bound1)
    b1 = jax.random.uniform(k2, (1, hidden), jnp.float32, -bound1, bound1)
    w2 = jax.random.uniform(k3, (hidden, output_dim), jnp.float32, -bound2, bound2)
    b2 = jax.random.uniform(k4, (1, output_dim), jnp.float32, -bound2, bound2)
    return w1, b1, w2, b2


if __name__ == "__main__":
    key = jax.random.PRNGKey(0)
    input_dim, output_dim = 32, 8

    kx, kp = jax.random.split(key)
    w1, b1, w2, b2 = init_params(kp, input_dim, output_dim)

    # Case 1: default path (bf16 x/w1, f32 elsewhere), B=256 -> grid of 2 tiles.
    B = 256
    x = jax.random.normal(kx, (B, input_dim), dtype=jnp.float32)
    out = jax.block_until_ready(policy_network_forward(x, w1, b1, w2, b2))
    assert out.shape == (B, output_dim)
    ref_f32 = jnp.maximum(x @ w1 + b1, 0.0) @ w2 + b2
    ref_mixed = (jnp.maximum(
        jnp.dot(x.astype(jnp.bfloat16), w1.astype(jnp.bfloat16),
                preferred_element_type=jnp.float32) + b1, 0.0) @ w2 + b2)
    assert jnp.allclose(out, ref_mixed, atol=1e-3, rtol=1e-3), "bf16 path mismatch"
    assert jnp.allclose(out, ref_f32, atol=1e-1, rtol=1e-1), "bf16 path drifted"

    # Case 2: all-f32 path with a ragged batch (B not a multiple of the tile),
    # exercising the masked last tile; tight tolerance vs the f32 reference.
    B2 = 200
    x2 = x[:B2]
    out_f32 = jax.block_until_ready(
        policy_network_forward(x2, w1, b1, w2, b2,
                               block_b=128, x_dtype=jnp.float32))
    ref2 = jnp.maximum(x2 @ w1 + b1, 0.0) @ w2 + b2
    assert out_f32.shape == (B2, output_dim)
    assert jnp.allclose(out_f32, ref2, atol=1e-5, rtol=1e-5), "f32 path mismatch"

    print("KERNEL_OK")
</pallas_src>

<mosaic_0001>
module attributes {stable_mosaic.version = 11 : i64} {
  func.func @policy_mlp_kernel(%arg0: i32, %arg1: memref<128x32xbf16, #tpu.memory_space<vmem>>, %arg2: memref<32x128xbf16, #tpu.memory_space<vmem>>, %arg3: memref<1x128xf32, #tpu.memory_space<vmem>>, %arg4: memref<128x8xf32, #tpu.memory_space<vmem>>, %arg5: memref<1x8xf32, #tpu.memory_space<vmem>>, %arg6: memref<128x8xf32, #tpu.memory_space<vmem>>) attributes {dimension_semantics = [#tpu.dimension_semantics<parallel>], iteration_bounds = array<i64: 2>, scalar_prefetch = 0 : i64, scratch_operands = 0 : i64, tpu.core_type = #tpu.core_type<tc>, window_params = [{transform_indices = @transform_0, window_bounds = array<i64: 128, 32>}, {pipeline_mode = #tpu.pipeline_mode<synchronous>, transform_indices = @transform_1, window_bounds = array<i64: 32, 128>}, {pipeline_mode = #tpu.pipeline_mode<synchronous>, transform_indices = @transform_2, window_bounds = array<i64: 1, 128>}, {pipeline_mode = #tpu.pipeline_mode<synchronous>, transform_indices = @transform_3, window_bounds = array<i64: 128, 8>}, {pipeline_mode = #tpu.pipeline_mode<synchronous>, transform_indices = @transform_4, window_bounds = array<i64: 1, 8>}, {transform_indices = @transform_5, window_bounds = array<i64: 128, 8>}]} {
    %c0 = arith.constant 0 : index
    %c0_0 = arith.constant 0 : index
    %0 = vector.load %arg1[%c0, %c0_0] : memref<128x32xbf16, #tpu.memory_space<vmem>>, vector<128x32xbf16>
    %c0_1 = arith.constant 0 : index
    %c0_2 = arith.constant 0 : index
    %1 = vector.load %arg2[%c0_1, %c0_2] : memref<32x128xbf16, #tpu.memory_space<vmem>>, vector<32x128xbf16>
    %cst = arith.constant dense<0.000000e+00> : vector<128x128xf32>
    %2 = tpu.matmul %0, %1, %cst {dimension_numbers = #tpu.dot_dimension_numbers<[1], [0], [0], [1], [0, 0, 1, 1], [], []>} : vector<128x32xbf16>, vector<32x128xbf16>, vector<128x128xf32> -> vector<128x128xf32>
    %c0_3 = arith.constant 0 : index
    %c0_4 = arith.constant 0 : index
    %3 = vector.load %arg3[%c0_3, %c0_4] : memref<1x128xf32, #tpu.memory_space<vmem>>, vector<1x128xf32>
    %4 = vector.broadcast %3 : vector<1x128xf32> to vector<128x128xf32>
    %5 = arith.addf %2, %4 : vector<128x128xf32>
    %cst_5 = arith.constant 0.000000e+00 : f32
    %6 = vector.broadcast %cst_5 : f32 to vector<128x128xf32>
    %7 = arith.maximumf %5, %6 : vector<128x128xf32>
    %c0_6 = arith.constant 0 : index
    %c0_7 = arith.constant 0 : index
    %8 = vector.load %arg4[%c0_6, %c0_7] : memref<128x8xf32, #tpu.memory_space<vmem>>, vector<128x8xf32>
    %cst_8 = arith.constant dense<0.000000e+00> : vector<128x8xf32>
    %9 = tpu.matmul %7, %8, %cst_8 {dimension_numbers = #tpu.dot_dimension_numbers<[1], [0], [0], [1], [0, 0, 1, 1], [], []>} : vector<128x128xf32>, vector<128x8xf32>, vector<128x8xf32> -> vector<128x8xf32>
    %c0_9 = arith.constant 0 : index
    %c0_10 = arith.constant 0 : index
    %10 = vector.load %arg5[%c0_9, %c0_10] : memref<1x8xf32, #tpu.memory_space<vmem>>, vector<1x8xf32>
    %11 = vector.broadcast %10 : vector<1x8xf32> to vector<128x8xf32>
    %12 = arith.addf %9, %11 : vector<128x8xf32>
    %c0_11 = arith.constant 0 : index
    %c0_12 = arith.constant 0 : index
    %13 = vector.load %arg6[%c0_11, %c0_12] : memref<128x8xf32, #tpu.memory_space<vmem>>, vector<128x8xf32>
    tpu.vector_store %arg6[%c0_11, %c0_12], %12 {strides = array<i32>} : memref<128x8xf32, #tpu.memory_space<vmem>>, vector<128x8xf32>,
    return
  }
  func.func @transform_0(%arg0: i32) -> (i32, i32) {
    %c0_i32 = arith.constant 0 : i32
    %c0_i32_0 = arith.constant 0 : i32
    return %arg0, %c0_i32 : i32, i32
  }
  func.func @transform_1(%arg0: i32) -> (i32, i32) {
    %c0_i32 = arith.constant 0 : i32
    %c0_i32_0 = arith.constant 0 : i32
    %c0_i32_1 = arith.constant 0 : i32
    return %c0_i32, %c0_i32_0 : i32, i32
  }
  func.func @transform_2(%arg0: i32) -> (i32, i32) {
    %c0_i32 = arith.constant 0 : i32
    %c0_i32_0 = arith.constant 0 : i32
    %c0_i32_1 = arith.constant 0 : i32
    return %c0_i32, %c0_i32_0 : i32, i32
  }
  func.func @transform_3(%arg0: i32) -> (i32, i32) {
    %c0_i32 = arith.constant 0 : i32
    %c0_i32_0 = arith.constant 0 : i32
    %c0_i32_1 = arith.constant 0 : i32
    return %c0_i32, %c0_i32_0 : i32, i32
  }
  func.func @transform_4(%arg0: i32) -> (i32, i32) {
    %c0_i32 = arith.constant 0 : i32
    %c0_i32_0 = arith.constant 0 : i32
    %c0_i32_1 = arith.constant 0 : i32
    return %c0_i32, %c0_i32_0 : i32, i32
  }
  func.func @transform_5(%arg0: i32) -> (i32, i32) {
    %c0_i32 = arith.constant 0 : i32
    %c0_i32_0 = arith.constant 0 : i32
    return %arg0, %c0_i32 : i32, i32
  }
}

</mosaic_0001>

<bundles_post_ra>
// kernel: tpu_custom_call.1
= control target key start
LH: loop header
LB: loop body
LE: loop exit
PB: predicated region body
PF: predicated region fallthrough
CT: control target
= control target key end

     0   :  { %s924_s18 = smov 0   ;;  %s1057_s0 = inlined_call_operand.vmem [shape: bf16[256,32], index: 0, kind: input, shape index: {}]   ;;  %s1058_s1 = inlined_call_operand.vmem [shape: bf16[32,128], index: 1, kind: input, shape index: {}]   ;;  %s1059_s2 = inlined_call_operand.vmem [shape: f32[1,128], index: 2, kind: input, shape index: {}]   ;;  %s1060_s3 = inlined_call_operand.vmem [shape: f32[128,8], index: 3, kind: input, shape index: {}]   ;;  %s1061_s4 = inlined_call_operand.vmem [shape: f32[1,8], index: 4, kind: input, shape index: {}]   ;;  %s1062_s5 = inlined_call_operand.vmem [shape: f32[256,8], index: 5, kind: output, shape index: {}]  }
   0x1 LB: > { %s687_s19 = sadd.s32 4294967295, %s892_s18   ;;  %p691_p0 = scmp.ge.s32.totalorder %s892_s18, 1  ;;  %s892_s18 = sphi %s924_s18, %s15_s18  }
   0x2   : > { %p188_p1 = scmp.lt.s32.totalorder %s892_s18, 3 }
   0x4   : > { %p189_p2 = pnand %p691_p0, %p188_p1 }
   0x5   : > { %s692_s22 = sshll.u32 (!%p189_p2), %s687_s19, 4 }
   0x6   : > { %192 = sbr.rel (%p189_p2) target bundleno = 449 (0x1c1), region = 40  ;;  %p217_p3 = scmp.lt.s32.totalorder (!%p189_p2), %s692_s22, 31 }
   0xb   : > { %v876_v0 = vld [vmem:[%s1058_s1 + $0x8] sm:$0xff]   ;;  %v877_v1 = vld [vmem:[%s1058_s1] sm:$0xff]   ;;  %v461_v2 = vld [vmem:[%s1060_s3 + $0x78] sm:$0xff]  ;;  %s1064_s22 = smov (!%p217_p3, %s692_s22), 31  ;;  %vm308_vm0 = vcmask 261120   ;;  %vm614_vm1 = vcmask 64512  }
   0xc   : > { %760 = vmatprep.subr.bf16.mxu0 %v876_v0  ;;  %836 = vmatprep.subr.mxu1 %v461_v2  ;;  %v460_v3 = vld [vmem:[%s1060_s3 + $0x70] sm:$0xff]  ;;  %s693_s29 = sshll.u32 %s1064_s22, 2  ;;  %v459_v4 = vld [vmem:[%s1060_s3 + $0x68] sm:$0xff]  ;;  %v458_v5 = vld [vmem:[%s1060_s3 + $0x60] sm:$0xff]  ;;  %s695_s15 = sshll.u32 %s1064_s22, 3 }
   0xd   : > { %761 = vmatpush3.bf16.msra.mxu0 %v876_v0  ;;  %852 = vmatpush3.msra.mxu1 %v461_v2  ;;  %s950_s7 = scalar_lea.vmem %s1057_s0, %s693_s29  ;;  %v457_v9 = vld [vmem:[%s1060_s3 + $0x58] sm:$0xff]  ;;  %v456_v10 = vld [vmem:[%s1060_s3 + $0x50] sm:$0xff]  ;;  %v455_v13 = vld [vmem:[%s1060_s3 + $0x48] sm:$0xff]  ;;  %s1020_s21 = scalar_lea.vmem %s1062_s5, %s695_s15 }
   0xe   : > { %762 = vmatprep.subr.bf16.mxu0 %v877_v1  ;;  %837 = vmatprep.subr.mxu1 %v460_v3  ;;  %v878_v6 = vld [vmem:[%s950_s7] sm:$0xff]   ;;  %v879_v7 = vld [vmem:[%s950_s7 + $0x8] sm:$0xff]   ;;  %v880_v8 = vld [vmem:[%s950_s7 + $0x10] sm:$0xff]  }
   0xf   : > { %853 = vmatpush3.msra.mxu1 %v460_v3  ;;  %764 = vmatprep.mubr.msk.bf16.mxu0 %vm308_vm0, %v878_v6  ;;  %v881_v11 = vld [vmem:[%s950_s7 + $0x18] sm:$0xff]   ;;  %v882_v12 = vld [vmem:[%s950_s7 + $0x20] sm:$0xff]   ;;  %v883_v16 = vld [vmem:[%s950_s7 + $0x28] sm:$0xff]  }
  0x10   : > { %838 = vmatprep.subr.mxu1 %v459_v4  ;;  %v454_v14 = vld [vmem:[%s1060_s3 + $0x40] sm:$0xff]  ;;  %v453_v15 = vld [vmem:[%s1060_s3 + $0x38] sm:$0xff]  ;;  %v884_v17 = vld [vmem:[%s950_s7 + $0x30] sm:$0xff]  }
  0x11   : > { %763 = vmatpush3.bf16.msra.mxu0 %v877_v1  ;;  %854 = vmatpush3.msra.mxu1 %v459_v4  ;;  %v452_v18 = vld [vmem:[%s1060_s3 + $0x30] sm:$0xff]  ;;  %v451_v19 = vld [vmem:[%s1060_s3 + $0x28] sm:$0xff]  ;;  %v885_v20 = vld [vmem:[%s950_s7 + $0x38] sm:$0xff]  }
  0x12   : > { %780 = vmatprep.subr.mxu0 %v461_v2  ;;  %839 = vmatprep.subr.mxu1 %v458_v5  ;;  %v450_v21 = vld [vmem:[%s1060_s3 + $0x20] sm:$0xff]  ;;  %v449_v22 = vld [vmem:[%s1060_s3 + $0x18] sm:$0xff]  ;;  %v448_v23 = vld [vmem:[%s1060_s3 + $0x10] sm:$0xff] }
  0x13   : > { %855 = vmatpush3.msra.mxu1 %v458_v5  ;;  %v447_v24 = vld [vmem:[%s1060_s3 + $0x8] sm:$0xff]  ;;  %v446_v25 = vld [vmem:[%s1060_s3] sm:$0xff] }
  0x14   : > { %765 = vmatmul.mubr.msk.bf16.vlgmr.msra.gmra.mxu0 %vm308_vm0, %v879_v7  ;;  %840 = vmatprep.subr.mxu1 %v457_v9  ;;  %v696_v27 = vld [vmem:[%s1059_s2] ss:$0 sm:$0xff] }
  0x15   : > { %768 = vmatprep.mubr.msk.bf16.mxu0 %vm308_vm0, %v880_v8  ;;  %781 = vmatpush3.msra.mxu0 %v461_v2 }
  0x16   : > { %782 = vmatprep.subr.mxu0 %v460_v3  ;;  %856 = vmatpush3.msra.mxu1 %v457_v9 }
  0x17   : > { %783 = vmatpush3.msra.mxu0 %v460_v3  ;;  %841 = vmatprep.subr.mxu1 %v456_v10 }
  0x18   : > { %784 = vmatprep.subr.mxu0 %v459_v4  ;;  %857 = vmatpush3.msra.mxu1 %v456_v10 }
  0x19   : > { %785 = vmatpush3.msra.mxu0 %v459_v4  ;;  %842 = vmatprep.subr.mxu1 %v455_v13 }
  0x1a   : > { %786 = vmatprep.subr.mxu0 %v458_v5  ;;  %858 = vmatpush3.msra.mxu1 %v455_v13 }
  0x1b   : > { %787 = vmatpush3.msra.mxu0 %v458_v5  ;;  %843 = vmatprep.subr.mxu1 %v454_v14 }
  0x1c   : > { %769 = vmatmul.mubr.msk.bf16.gmra.mxu0 %vm308_vm0, %v881_v11  ;;  %788 = vmatprep.subr.mxu0 %v457_v9  ;;  %v715_v11 = vld [vmem:[%s1061_s4] ss:$0 sm:$0xff] }
  0x1d   : > { %772 = vmatprep.mubr.msk.bf16.mxu0 %vm308_vm0, %v882_v12  ;;  %789 = vmatpush3.msra.mxu0 %v457_v9 }
  0x1e   : > { %790 = vmatprep.subr.mxu0 %v456_v10  ;;  %859 = vmatpush3.msra.mxu1 %v454_v14 }
  0x1f   : > { %791 = vmatpush3.msra.mxu0 %v456_v10  ;;  %844 = vmatprep.subr.mxu1 %v453_v15 }
  0x20   : > { %792 = vmatprep.subr.mxu0 %v455_v13  ;;  %860 = vmatpush3.msra.mxu1 %v453_v15 }
  0x21   : > { %793 = vmatpush3.msra.mxu0 %v455_v13  ;;  %845 = vmatprep.subr.mxu1 %v452_v18 }
  0x22   : > { %794 = vmatprep.subr.mxu0 %v454_v14  ;;  %861 = vmatpush3.msra.mxu1 %v452_v18 }
  0x23   : > { %795 = vmatpush3.msra.mxu0 %v454_v14  ;;  %846 = vmatprep.subr.mxu1 %v451_v19 }
  0x24   : > { %773 = vmatmul.mubr.msk.bf16.gmra.mxu0 %vm308_vm0, %v883_v16  ;;  %796 = vmatprep.subr.mxu0 %v453_v15 }
  0x25   : > { %776 = vmatprep.mubr.msk.bf16.mxu0 %vm308_vm0, %v884_v17  ;;  %797 = vmatpush3.msra.mxu0 %v453_v15 }
  0x26   : > { %798 = vmatprep.subr.mxu0 %v452_v18  ;;  %862 = vmatpush3.msra.mxu1 %v451_v19 }
  0x27   : > { %799 = vmatpush3.msra.mxu0 %v452_v18  ;;  %847 = vmatprep.subr.mxu1 %v450_v21 }
  0x28   : > { %800 = vmatprep.subr.mxu0 %v451_v19  ;;  %863 = vmatpush3.msra.mxu1 %v450_v21 }
  0x29   : > { %801 = vmatpush3.msra.mxu0 %v451_v19  ;;  %848 = vmatprep.subr.mxu1 %v449_v22 }
  0x2a   : > { %802 = vmatprep.subr.mxu0 %v450_v21  ;;  %864 = vmatpush3.msra.mxu1 %v449_v22 }
  0x2b   : > { %803 = vmatpush3.msra.mxu0 %v450_v21  ;;  %849 = vmatprep.subr.mxu1 %v448_v23 }
  0x2c   : > { %777 = vmatmul.mubr.msk.bf16.gmra.mxu0 %vm308_vm0, %v885_v20  ;;  %804 = vmatprep.subr.mxu0 %v449_v22 }
  0x2d   : > { %805 = vmatpush3.msra.mxu0 %v449_v22  ;;  %865 = vmatpush3.msra.mxu1 %v448_v23 }
  0x2e   : > { %806 = vmatprep.subr.mxu0 %v448_v23  ;;  %850 = vmatprep.subr.mxu1 %v447_v24 }
  0x2f   : > { %807 = vmatpush3.msra.mxu0 %v448_v23  ;;  %866 = vmatpush3.msra.mxu1 %v447_v24 }
  0x30   : > { %808 = vmatprep.subr.mxu0 %v447_v24  ;;  %851 = vmatprep.subr.mxu1 %v446_v25 }
  0x31   : > { %809 = vmatpush3.msra.mxu0 %v447_v24  ;;  %867 = vmatpush3.msra.mxu1 %v446_v25 }
  0x32   : > { %810 = vmatprep.subr.mxu0 %v446_v25 }
  0x33   : > { %811 = vmatpush3.msra.mxu0 %v446_v25 }
  0xd4   : > { %v766_v26 = vpop.f32.mrf.mxu0 }
  0xd5   : > { %v376_v32 = vadd.f32 %v766_v26, %v696_v27 }
  0xd6   : > { %v367_v28 = vpop.f32.mrf.mxu0 }
  0xd7   : > { %v368_v29 = vadd.f32 %v696_v27, %v367_v28  ;;  %v432_v39 = vmax.f32 %v376_v32, 0.0 }
  0xd8   : > { %v767_v30 = vpop.f32.mrf.mxu0 }
  0xd9   : > { %v430_v31 = vmax.f32 %v368_v29, 0.0  ;;  %v379_v36 = vadd.f32 %v767_v30, %v696_v27 }
  0xda   : > { %v370_v33 = vpop.f32.mrf.mxu0 }
  0xdb   : > { %v371_v34 = vadd.f32 %v696_v27, %v370_v33  ;;  %812 = vmatprep.mubr.f32.mxu0 %v430_v31  ;;  %v433_v44 = vmax.f32 %v379_v36, 0.0 }
  0xdc   : > { %v770_v35 = vpop.f32.mrf.mxu0 }
  0xdd   : > { %v431_v37 = vmax.f32 %v371_v34, 0.0  ;;  %v392_v38 = vadd.f32 %v770_v35, %v696_v27 }
  0xde   : > { %v383_v40 = vpop.f32.mrf.mxu0 }
  0xdf   : > { %v384_v41 = vadd.f32 %v696_v27, %v383_v40  ;;  %813 = vmatmul.mubr.f32.vlgmr.msra.gmra.mxu0 %v431_v37  ;;  %v436_v42 = vmax.f32 %v392_v38, 0.0 }
  0xe0   : > { %v771_v43 = vpop.f32.mrf.mxu0  ;;  %815 = vmatprep.mubr.f32.mxu0 %v432_v39 }
  0xe1   : > { %v434_v45 = vmax.f32 %v384_v41, 0.0  ;;  %v395_v46 = vadd.f32 %v771_v43, %v696_v27  ;;  %821 = vmatprep.mubr.f32.mxu1 %v436_v42 }
  0xe2   : > { %v386_v47 = vpop.f32.mrf.mxu0 }
  0xe3   : > { %v437_v48 = vmax.f32 %v395_v46, 0.0  ;;  %v387_v49 = vadd.f32 %v696_v27, %v386_v47  ;;  %816 = vmatmul.mubr.f32.gmra.mxu0 %v433_v44 }
  0xe4   : > { %v774_v50 = vpop.f32.mrf.mxu0  ;;  %818 = vmatprep.mubr.f32.mxu0 %v434_v45 }
  0xe5   : > { %v435_v51 = vmax.f32 %v387_v49, 0.0  ;;  %822 = vmatmul.mubr.f32.vlgmr.msra.gmra.mxu1 %v437_v48  ;;  %v408_v56 = vadd.f32 %v774_v50, %v696_v27 }
  0xe6   : > { %v399_v52 = vpop.f32.mrf.mxu0 }
  0xe7   : > { %v400_v53 = vadd.f32 %v696_v27, %v399_v52  ;;  %819 = vmatmul.mubr.f32.gmra.mxu0 %v435_v51  ;;  %v440_v62 = vmax.f32 %v408_v56, 0.0 }
  0xe8   : > { %v775_v54 = vpop.f32.mrf.mxu0 }
  0xe9   : > { %v438_v55 = vmax.f32 %v400_v53, 0.0  ;;  %v411_v60 = vadd.f32 %v775_v54, %v696_v27 }
  0xea   : > { %v402_v57 = vpop.f32.mrf.mxu0 }
  0xeb   : > { %v403_v58 = vadd.f32 %v696_v27, %v402_v57  ;;  %824 = vmatprep.mubr.f32.mxu1 %v438_v55  ;;  %v441_v2 = vmax.f32 %v411_v60, 0.0 }
  0xec   : > { %v778_v59 = vpop.f32.mrf.mxu0 }
  0xed   : > { %v439_v61 = vmax.f32 %v403_v58, 0.0  ;;  %v424_v4 = vadd.f32 %v778_v59, %v696_v27 }
  0xee   : > { %v415_v63 = vpop.f32.mrf.mxu0 }
  0xef   : > { %v416_v0 = vadd.f32 %v696_v27, %v415_v63  ;;  %825 = vmatmul.mubr.f32.gmra.mxu1 %v439_v61  ;;  %v444_v9 = vmax.f32 %v424_v4, 0.0 }
  0xf0   : > { %v779_v1 = vpop.f32.mrf.mxu0  ;;  %827 = vmatprep.mubr.f32.mxu1 %v440_v62 }
  0xf1   : > { %v442_v3 = vmax.f32 %v416_v0, 0.0  ;;  %v427_v7 = vadd.f32 %v779_v1, %v696_v27 }
  0xf2   : > { %v418_v5 = vpop.f32.mrf.mxu0 }
  0xf3   : > { %v419_v6 = vadd.f32 %v696_v27, %v418_v5  ;;  %828 = vmatmul.mubr.f32.gmra.mxu1 %v441_v2  ;;  %v445_v10 = vmax.f32 %v427_v7, 0.0 }
  0xf4   : > { %830 = vmatprep.mubr.f32.mxu1 %v442_v3 }
  0xf5   : > { %v443_v8 = vmax.f32 %v419_v6, 0.0 }
  0xf7   : > { %831 = vmatmul.mubr.f32.gmra.mxu1 %v443_v8 }
  0xf8   : > { %833 = vmatprep.mubr.f32.mxu1 %v444_v9 }
  0xfb   : > { %834 = vmatmul.mubr.f32.gmra.mxu1 %v445_v10 }
 0x19f   : > { %v814_v12 = vpop.f32.mrf.mxu0 }
 0x1a0   : > { %v541_v13 = vadd.f32 %v814_v12, %v715_v11 }
 0x1a1   : > { %v535_v14 = vpop.f32.mrf.mxu0 }
 0x1a2   : > { %616 = vst.msk [vmem:[%s1020_s21 + $0x8] sm:$0xff] %vm614_vm1, %v541_v13  ;;  %v536_v15 = vadd.f32 %v715_v11, %v535_v14 }
 0x1a3   : > { %v817_v16 = vpop.f32.mrf.mxu0 }
 0x1a4   : > { %615 = vst.msk [vmem:[%s1020_s21] sm:$0xff] %vm614_vm1, %v536_v15  ;;  %v551_v17 = vadd.f32 %v817_v16, %v715_v11 }
 0x1a5   : > { %v545_v18 = vpop.f32.mrf.mxu0  ;;  %v823_v19 = vpop.f32.mrf.mxu1 }
 0x1a6   : > { %618 = vst.msk [vmem:[%s1020_s21 + $0x18] sm:$0xff] %vm614_vm1, %v551_v17  ;;  %v546_v20 = vadd.f32 %v715_v11, %v545_v18  ;;  %v571_v21 = vadd.f32 %v823_v19, %v715_v11 }
 0x1a7   : > { %v820_v22 = vpop.f32.mrf.mxu0  ;;  %v565_v23 = vpop.f32.mrf.mxu1 }
 0x1a8   : > { %617 = vst.msk [vmem:[%s1020_s21 + $0x10] sm:$0xff] %vm614_vm1, %v546_v20  ;;  %622 = vst.msk [vmem:[%s1020_s21 + $0x38] sm:$0xff] %vm614_vm1, %v571_v21  ;;  %v561_v24 = vadd.f32 %v820_v22, %v715_v11  ;;  %v566_v25 = vadd.f32 %v715_v11, %v565_v23 }
 0x1a9   : > { %v555_v26 = vpop.f32.mrf.mxu0 }
 0x1aa   : > { %620 = vst.msk [vmem:[%s1020_s21 + $0x28] sm:$0xff] %vm614_vm1, %v561_v24  ;;  %621 = vst.msk [vmem:[%s1020_s21 + $0x30] sm:$0xff] %vm614_vm1, %v566_v25  ;;  %v556_v27 = vadd.f32 %v715_v11, %v555_v26 }
 0x1ac   : > { %619 = vst.msk [vmem:[%s1020_s21 + $0x20] sm:$0xff] %vm614_vm1, %v556_v27 }
 0x1af   : > { %v826_v28 = vpop.f32.mrf.mxu1 }
 0x1b0   : > { %v581_v29 = vadd.f32 %v826_v28, %v715_v11 }
 0x1b1   : > { %v575_v30 = vpop.f32.mrf.mxu1 }
 0x1b2   : > { %624 = vst.msk [vmem:[%s1020_s21 + $0x48] sm:$0xff] %vm614_vm1, %v581_v29  ;;  %v576_v31 = vadd.f32 %v715_v11, %v575_v30 }
 0x1b3   : > { %v829_v32 = vpop.f32.mrf.mxu1 }
 0x1b4   : > { %623 = vst.msk [vmem:[%s1020_s21 + $0x40] sm:$0xff] %vm614_vm1, %v576_v31  ;;  %v591_v33 = vadd.f32 %v829_v32, %v715_v11 }
 0x1b5   : > { %v585_v34 = vpop.f32.mrf.mxu1 }
 0x1b6   : > { %626 = vst.msk [vmem:[%s1020_s21 + $0x58] sm:$0xff] %vm614_vm1, %v591_v33  ;;  %v586_v35 = vadd.f32 %v715_v11, %v585_v34 }
 0x1b7   : > { %v832_v36 = vpop.f32.mrf.mxu1 }
 0x1b8   : > { %625 = vst.msk [vmem:[%s1020_s21 + $0x50] sm:$0xff] %vm614_vm1, %v586_v35  ;;  %v601_v37 = vadd.f32 %v832_v36, %v715_v11 }
 0x1b9   : > { %v595_v38 = vpop.f32.mrf.mxu1 }
 0x1ba   : > { %628 = vst.msk [vmem:[%s1020_s21 + $0x68] sm:$0xff] %vm614_vm1, %v601_v37  ;;  %v596_v39 = vadd.f32 %v715_v11, %v595_v38 }
 0x1bb   : > { %v835_v40 = vpop.f32.mrf.mxu1 }
 0x1bc   : > { %627 = vst.msk [vmem:[%s1020_s21 + $0x60] sm:$0xff] %vm614_vm1, %v596_v39  ;;  %v611_v41 = vadd.f32 %v835_v40, %v715_v11 }
 0x1bd   : > { %v605_v42 = vpop.f32.mrf.mxu1 }
 0x1be   : > { %630 = vst.msk [vmem:[%s1020_s21 + $0x78] sm:$0xff] %vm614_vm1, %v611_v41  ;;  %v606_v43 = vadd.f32 %v715_v11, %v605_v42 }
 0x1c0   : > { %629 = vst.msk [vmem:[%s1020_s21 + $0x70] sm:$0xff] %vm614_vm1, %v606_v43 }
 0x1c1 PF: > { %s15_s18 = sadd.s32 1, %s892_s18  }
 0x1c2   : > { %p12_p4 = scmp.ge.s32.totalorder %s15_s18, 4  }
 0x1c4   :  { %14 = sbr.rel (!%p12_p4) target bundleno = 1 (0x1), region = 70 }

</bundles_post_ra>
